<compile_context>
chip_gen: v7x
topology: tpu7x:2x2x1
jax: 0.10.0
libtpu: 0.0.40
codegen_flags: <defaults>
</compile_context>

<pallas_src>
import functools

import jax
import jax.numpy as jnp
from jax.experimental import pallas as pl
from jax.experimental.pallas import tpu as pltpu

_LANE = 128
_TARGET_TILE_BYTES = 2 * 1024 * 1024  # per operand, per pipeline buffer


def _cdiv(a, b):
    return -(-a // b)


def _round_up(a, m):
    return _cdiv(a, m) * m


def _pick_tiling(rows, itemsize):
    """Pick (tile_r, grid_n) for a (rows, 128) slab.

    tile_r is a multiple of 8 (unless a single full block), sized so each
    operand's per-step DMA is ~_TARGET_TILE_BYTES regardless of dtype, and
    grid_n >= 2 (even) whenever rows >= 16 so v7x megacore has work for both
    TensorCores.
    """
    max_tile_r = max(8, (_TARGET_TILE_BYTES // (_LANE * itemsize)) // 8 * 8)
    if rows < 16:
        return rows, 1  # single block == full dim (allowed even if not %8)
    grid_target = max(2, _cdiv(rows, max_tile_r))
    if grid_target % 2:
        grid_target += 1  # balanced split across 2 TCs on v7x
    tile_r = min(max_tile_r, _round_up(_cdiv(rows, grid_target), 8))
    grid_n = _cdiv(rows, tile_r)  # last block may be row-partial (masked in-kernel)
    return tile_r, grid_n


def _make_kernel(pad_threshold, grid_n, valid_rows_last, tile_r):
    """Builds the per-block partial-reduction kernel (all args static)."""
    has_partial = valid_rows_last != tile_r

    def compute(pred_ref, label_ref, sum_ref, cnt_ref, valid_rows):
        p = pred_ref[...].astype(jnp.float32)
        l = label_ref[...].astype(jnp.float32)
        d = p - l
        sq = d * d
        keep = None
        if pad_threshold is not None:
            thr = jnp.float32(pad_threshold)
            keep = (p >= thr) & (l >= thr)
        if valid_rows is not None:
            # Row-partial last block: rows >= valid_rows hold unspecified data
            # (Pallas pads partial blocks); mask them out exactly.
            row_id = jax.lax.broadcasted_iota(jnp.int32, p.shape, 0)
            in_bounds = row_id < valid_rows
            keep = in_bounds if keep is None else (keep & in_bounds)
        if keep is None:
            sum_ref[...] = jnp.sum(sq, axis=0, keepdims=True)
        else:
            # Must stay a select (jnp.where), not `mask * sq`, so garbage
            # (possibly inf/NaN) in padded rows can never propagate.
            sum_ref[...] = jnp.sum(jnp.where(keep, sq, jnp.float32(0.0)),
                                   axis=0, keepdims=True)
        if cnt_ref is not None:
            # Exact int32 per-lane counts (threshold path only).
            cnt_ref[...] = jnp.sum(keep.astype(jnp.int32), axis=0,
                                   keepdims=True)

    def dispatch(pred_ref, label_ref, sum_ref, cnt_ref):
        if not has_partial:
            compute(pred_ref, label_ref, sum_ref, cnt_ref, None)
            return
        i = pl.program_id(0)

        @pl.when(i == grid_n - 1)
        def _():
            compute(pred_ref, label_ref, sum_ref, cnt_ref, valid_rows_last)

        @pl.when(i != grid_n - 1)
        def _():
            compute(pred_ref, label_ref, sum_ref, cnt_ref, None)

    if pad_threshold is None:

        def kernel(pred_ref, label_ref, sum_ref):
            dispatch(pred_ref, label_ref, sum_ref, None)

        return kernel

    def kernel(pred_ref, label_ref, sum_ref, cnt_ref):
        dispatch(pred_ref, label_ref, sum_ref, cnt_ref)

    return kernel


def _masked_sum_count(p, l, pad_threshold):
    """Plain-JAX partial for the tiny (<128-element) lane remainder."""
    p = p.astype(jnp.float32)
    l = l.astype(jnp.float32)
    d = p - l
    sq = d * d
    if pad_threshold is None:
        return jnp.sum(sq), None
    thr = jnp.float32(pad_threshold)
    keep = (p >= thr) & (l >= thr)
    return (jnp.sum(jnp.where(keep, sq, jnp.float32(0.0))),
            jnp.sum(keep.astype(jnp.int32)))


@functools.partial(jax.jit, static_argnames=("pad_threshold",))
def mse_loss(pred, label, pad_threshold=None):
    """Pallas implementation of MSELoss.forward."""
    assert pred.shape == label.shape
    n_total = int(pred.size)
    if n_total == 0:
        return jnp.float32(float("nan"))  # matches torch.mean of empty tensor

    p_flat = jnp.ravel(pred)
    l_flat = jnp.ravel(label)

    rows = n_total // _LANE
    rem = n_total - rows * _LANE
    n_main = rows * _LANE

    # Tiny inputs (< one 128-lane row): plain JAX, no kernel.
    if rows == 0:
        s, c = _masked_sum_count(p_flat, l_flat, pad_threshold)
        if pad_threshold is None:
            return s / jnp.float32(n_total)
        return s / c.astype(jnp.float32)

    if rem:
        # Peel off only the <128-element lane remainder; the aligned prefix
        # feeds the kernel.  No full-array concatenate pad anymore.
        p_main = jax.lax.slice(p_flat, (0,), (n_main,))
        l_main = jax.lax.slice(l_flat, (0,), (n_main,))
    else:
        p_main, l_main = p_flat, l_flat

    p2 = p_main.reshape(rows, _LANE)
    l2 = l_main.reshape(rows, _LANE)

    itemsize = max(jnp.dtype(pred.dtype).itemsize,
                   jnp.dtype(label.dtype).itemsize)
    tile_r, grid_n = _pick_tiling(rows, itemsize)
    valid_rows_last = rows - (grid_n - 1) * tile_r

    kernel = _make_kernel(pad_threshold, grid_n, valid_rows_last, tile_r)

    out_width = grid_n * _LANE
    sum_shape = jax.ShapeDtypeStruct((1, out_width), jnp.float32)
    sum_spec = pl.BlockSpec((1, _LANE), lambda i: (0, i))
    if pad_threshold is None:
        out_shape = sum_shape
        out_specs = sum_spec
        n_outs = 1
    else:
        out_shape = (sum_shape,
                     jax.ShapeDtypeStruct((1, out_width), jnp.int32))
        out_specs = (sum_spec, pl.BlockSpec((1, _LANE), lambda i: (0, i)))
        n_outs = 2

    bytes_in = (jnp.dtype(pred.dtype).itemsize
                + jnp.dtype(label.dtype).itemsize) * n_main
    cost = pl.CostEstimate(flops=3 * n_main, transcendentals=0,
                           bytes_accessed=bytes_in + n_outs * out_width * 4)

    out = pl.pallas_call(
        kernel,
        out_shape=out_shape,
        grid_spec=pltpu.PrefetchScalarGridSpec(
            num_scalar_prefetch=0,
            grid=(grid_n,),
            in_specs=[
                pl.BlockSpec((tile_r, _LANE), lambda i: (i, 0)),
                pl.BlockSpec((tile_r, _LANE), lambda i: (i, 0)),
            ],
            out_specs=out_specs,
        ),
        compiler_params=pltpu.CompilerParams(
            dimension_semantics=("parallel",),
            vmem_limit_bytes=32 * 1024 * 1024,
        ),
        cost_estimate=cost,
    )(p2, l2)

    if pad_threshold is None:
        total = jnp.sum(out)
        if rem:
            tail_sum, _ = _masked_sum_count(
                jax.lax.slice(p_flat, (n_main,), (n_total,)),
                jax.lax.slice(l_flat, (n_main,), (n_total,)), None)
            total = total + tail_sum
        return total / jnp.float32(n_total)

    sum_partials, cnt_partials = out
    total = jnp.sum(sum_partials)
    count = jnp.sum(cnt_partials)  # int32: exact up to 2**31-1 kept elements
    if rem:
        tail_sum, tail_cnt = _masked_sum_count(
            jax.lax.slice(p_flat, (n_main,), (n_total,)),
            jax.lax.slice(l_flat, (n_main,), (n_total,)), pad_threshold)
        total = total + tail_sum
        count = count + tail_cnt
    # 0/0 -> NaN when nothing survives the mask (matches torch.mean of empty).
    return total / count.astype(jnp.float32)


def _reference_mse(pred, label, pad_threshold=None):
    p = pred.astype(jnp.float32)
    l = label.astype(jnp.float32)
    if pad_threshold is not None:
        mask = (p >= pad_threshold) & (l >= pad_threshold)
        num = jnp.sum(jnp.where(mask, (p - l) ** 2, 0.0))
        den = jnp.sum(mask.astype(jnp.float32))
        return num / den
    return jnp.mean((p - l) ** 2)


if __name__ == "__main__":
    key = jax.random.PRNGKey(0)
    keys = jax.random.split(key, 6)
    thr = -0.25

    # 1) Small NCHW case: 2048 elements -> rows=16 -> grid 2 x tile 8.
    shape = (2, 4, 16, 16)
    pred = jax.random.normal(keys[0], shape, dtype=jnp.float32)
    label = jax.random.normal(keys[1], shape, dtype=jnp.float32)

    out_plain = mse_loss(pred, label, pad_threshold=None)
    jax.block_until_ready(out_plain)
    assert jnp.allclose(out_plain, _reference_mse(pred, label, None),
                        rtol=1e-5, atol=1e-6)

    out_thr = mse_loss(pred, label, pad_threshold=thr)
    jax.block_until_ready(out_thr)
    assert jnp.allclose(out_thr, _reference_mse(pred, label, thr),
                        rtol=1e-5, atol=1e-6)

    # 2) Non-128-aligned case: exercises the <128-element wrapper tail
    #    (n_total = 532504, rem = 24) with a 2-block grid.
    shape2 = (2, 4, 257, 259)
    pred2 = jax.random.normal(keys[2], shape2, dtype=jnp.float32)
    label2 = jax.random.normal(keys[3], shape2, dtype=jnp.float32)

    out2_plain = mse_loss(pred2, label2, pad_threshold=None)
    jax.block_until_ready(out2_plain)
    assert jnp.allclose(out2_plain, _reference_mse(pred2, label2, None),
                        rtol=1e-4, atol=1e-6)

    out2_thr = mse_loss(pred2, label2, pad_threshold=thr)
    jax.block_until_ready(out2_thr)
    assert jnp.allclose(out2_thr, _reference_mse(pred2, label2, thr),
                        rtol=1e-4, atol=1e-6)

    # 3) Row-partial last block: rows=150 -> grid 2 x tile 80, last block has
    #    only 70 valid rows (in-kernel iota mask path).
    shape3 = (1, 3, 50, 128)
    pred3 = jax.random.normal(keys[4], shape3, dtype=jnp.float32)
    label3 = jax.random.normal(keys[5], shape3, dtype=jnp.float32)

    out3_plain = mse_loss(pred3, label3, pad_threshold=None)
    jax.block_until_ready(out3_plain)
    assert jnp.allclose(out3_plain, _reference_mse(pred3, label3, None),
                        rtol=1e-5, atol=1e-6)

    out3_thr = mse_loss(pred3, label3, pad_threshold=thr)
    jax.block_until_ready(out3_thr)
    assert jnp.allclose(out3_thr, _reference_mse(pred3, label3, thr),
                        rtol=1e-5, atol=1e-6)

    print("KERNEL_OK")
</pallas_src>

<mosaic_0001>
module attributes {stable_mosaic.version = 11 : i64} {
  func.func @kernel(%arg0: i32, %arg1: memref<8x128xf32, #tpu.memory_space<vmem>>, %arg2: memref<8x128xf32, #tpu.memory_space<vmem>>, %arg3: memref<1x128xf32, #tpu.memory_space<vmem>>) attributes {dimension_semantics = [#tpu.dimension_semantics<parallel>], iteration_bounds = array<i64: 2>, scalar_prefetch = 0 : i64, scratch_operands = 0 : i64, tpu.core_type = #tpu.core_type<tc>, window_params = [{transform_indices = @transform_0, window_bounds = array<i64: 8, 128>}, {transform_indices = @transform_1, window_bounds = array<i64: 8, 128>}, {transform_indices = @transform_2, window_bounds = array<i64: 1, 128>}]} {
    %c0 = arith.constant 0 : index
    %c0_0 = arith.constant 0 : index
    %0 = vector.load %arg1[%c0, %c0_0] : memref<8x128xf32, #tpu.memory_space<vmem>>, vector<8x128xf32>
    %c0_1 = arith.constant 0 : index
    %c0_2 = arith.constant 0 : index
    %1 = vector.load %arg2[%c0_1, %c0_2] : memref<8x128xf32, #tpu.memory_space<vmem>>, vector<8x128xf32>
    %2 = arith.subf %0, %1 : vector<8x128xf32>
    %3 = arith.mulf %2, %2 : vector<8x128xf32>
    %cst = arith.constant dense<0.000000e+00> : vector<128xf32>
    %4 = vector.multi_reduction <add>, %3, %cst [0] : vector<8x128xf32> to vector<128xf32>
    %5 = vector.shape_cast %4 : vector<128xf32> to vector<1x128xf32>
    %c0_3 = arith.constant 0 : index
    %c0_4 = arith.constant 0 : index
    %6 = vector.load %arg3[%c0_3, %c0_4] : memref<1x128xf32, #tpu.memory_space<vmem>>, vector<1x128xf32>
    tpu.vector_store %arg3[%c0_3, %c0_4], %5 {strides = array<i32>} : memref<1x128xf32, #tpu.memory_space<vmem>>, vector<1x128xf32>,
    return
  }
  func.func @transform_0(%arg0: i32) -> (i32, i32) {
    %c0_i32 = arith.constant 0 : i32
    %c0_i32_0 = arith.constant 0 : i32
    return %arg0, %c0_i32 : i32, i32
  }
  func.func @transform_1(%arg0: i32) -> (i32, i32) {
    %c0_i32 = arith.constant 0 : i32
    %c0_i32_0 = arith.constant 0 : i32
    return %arg0, %c0_i32 : i32, i32
  }
  func.func @transform_2(%arg0: i32) -> (i32, i32) {
    %c0_i32 = arith.constant 0 : i32
    %c0_i32_0 = arith.constant 0 : i32
    return %c0_i32, %arg0 : i32, i32
  }
}

</mosaic_0001>

<bundles_post_ra>
// kernel: mse_loss.1
= control target key start
LH: loop header
LB: loop body
LE: loop exit
PB: predicated region body
PF: predicated region fallthrough
CT: control target
= control target key end

     0   :  { %s264_s9 = smov 0   ;;  %s278_s0 = inlined_call_operand.vmem [shape: f32[16,128], index: 0, kind: input, shape index: {}]   ;;  %s279_s1 = inlined_call_operand.vmem [shape: f32[16,128], index: 1, kind: input, shape index: {}]   ;;  %s280_s2 = inlined_call_operand.vmem [shape: f32[1,256], index: 2, kind: output, shape index: {}]  }
   0x1 LB: > { %s224_s10 = sadd.s32 4294967295, %s247_s9   ;;  %p228_p0 = scmp.ge.s32.totalorder %s247_s9, 1  ;;  %s247_s9 = sphi %s264_s9, %s12_s9  }
   0x2   : > { %p120_p1 = scmp.lt.s32.totalorder %s247_s9, 3 }
   0x4   : > { %p121_p2 = pnand %p228_p0, %p120_p1 }
   0x5   : > { %p143_p3 = scmp.lt.s32.totalorder (!%p121_p2), %s224_s10, 1 }
   0x6   : > { %124 = sbr.rel (%p121_p2) target bundleno = 35 (0x23), region = 28 }
   0xd   : > { %s282_s10 = smov (!%p143_p3, %s224_s10), 1 }
   0xe   : > { %s229_s11 = sshll.u32 %s282_s10, 3  ;;  %s153_s20 = scalar_lea.vmem %s280_s2, %s282_s10 }
   0xf   : > { %s146_s14 = scalar_lea.vmem %s278_s0, %s229_s11  ;;  %s150_s17 = scalar_lea.vmem %s279_s1, %s229_s11 }
  0x10   : > { %v154_v0 = vld [vmem:[%s146_s14] sm:$0xff] }
  0x11   : > { %v155_v1 = vld [vmem:[%s150_s17] sm:$0xff] }
  0x12   : > { %v156_v2 = vsub.f32 %v154_v0, %v155_v1 }
  0x14   : > { %v157_v3 = vmul.f32 %v156_v2, %v156_v2 }
  0x16   : > { %v158_v4 = vrot.slane %v157_v3, 4 }
  0x18   : > { %v159_v5 = vadd.f32 %v158_v4, %v157_v3 }
  0x1a   : > { %v160_v6 = vrot.slane %v159_v5, 2 }
  0x1c   : > { %v161_v7 = vadd.f32 %v160_v6, %v159_v5 }
  0x1e   : > { %v162_v8 = vrot.slane %v161_v7, 1 }
  0x20   : > { %v163_v9 = vadd.f32 %v162_v8, %v161_v7 }
  0x22   : > { %164 = vst [vmem:[%s153_s20] sm:$0x1] %v163_v9 }
  0x23 PF: > { %s12_s9 = sadd.s32 1, %s247_s9  }
  0x24   : > { %p9_p4 = scmp.ge.s32.totalorder %s12_s9, 4  }
  0x26   :  { %11 = sbr.rel (!%p9_p4) target bundleno = 1 (0x1), region = 61 }

</bundles_post_ra>
